<compile_context>
chip_gen: v6e
topology: v6e:2x2x1
jax: 0.10.0
libtpu: 0.0.40
codegen_flags: <defaults>
</compile_context>

<pallas_src>
import functools

import jax
import jax.numpy as jnp
import numpy as np
from jax import lax
from jax.experimental import pallas as pl
from jax.experimental.pallas import tpu as pltpu

# Labels of torchaudio WAV2VEC2_ASR_BASE_960H (blank = index 0), defined
# in-script (deterministic, no checkpoint / bundle download).
LABELS = ('-', '|', 'E', 'T', 'A', 'O', 'N', 'I', 'H', 'S', 'R', 'D', 'L',
          'U', 'M', 'W', 'C', 'F', 'G', 'Y', 'P', 'B', 'V', 'K', "'", 'X',
          'J', 'Q', 'Z')
BLANK = 0

_DEFAULT_T_TILE = 512   # rows per grid step for long sequences (multiple of 8)


def _ctc_greedy_kernel(e_ref, out_ref, carry_ref, *, blank):
    """One tile of T_TILE frames.

    e_ref:     (T_TILE, L) f32 emission tile
    out_ref:   (1, T_TILE) int32 -- argmax index if the frame survives greedy
               CTC collapse (unique_consecutive + blank drop), else -1
    carry_ref: (1, 1) int32 VMEM scratch -- previous tile's last argmax
    """
    tile = pl.program_id(0)

    @pl.when(tile == 0)
    def _init():
        # Sentinel "no previous symbol" so the global first frame is kept.
        carry_ref[...] = jnp.full((1, 1), -1, dtype=jnp.int32)

    e = e_ref[...]                                          # (TT, L) f32
    TT, L = e.shape

    # --- argmax over labels (first maximal index, matches jnp/torch) --------
    m = jnp.max(e, axis=-1, keepdims=True)                  # (TT, 1)
    lab = lax.broadcasted_iota(jnp.int32, (TT, L), 1)       # (TT, L)
    cand = jnp.where(e == m, lab, jnp.int32(L))             # non-max -> L
    idx = jnp.min(cand, axis=-1, keepdims=True)             # (TT, 1) int32
    # NaN guard: a NaN row gives idx == L; treat it as blank so it is dropped
    # instead of producing an out-of-range label lookup on host.
    idx = jnp.where(idx >= jnp.int32(L), jnp.int32(blank), idx)

    # --- relayout (TT, 1) sublane-major -> (1, TT) lane-major ---------------
    # (broadcast + diagonal mask + sublane reduce, done in <=128-row chunks so
    # the intermediate stays a handful of vregs)
    rows = []
    r0 = 0
    while r0 < TT:
        R = min(128, TT - r0)
        seg = idx[r0:r0 + R, :]                              # (R, 1)
        ri = lax.broadcasted_iota(jnp.int32, (R, R), 0)
        ci = lax.broadcasted_iota(jnp.int32, (R, R), 1)
        rows.append(jnp.sum(
            jnp.where(ri == ci, jnp.broadcast_to(seg, (R, R)), jnp.int32(0)),
            axis=0, keepdims=True))                          # (1, R)
        r0 += R
    idx_row = rows[0] if len(rows) == 1 else jnp.concatenate(rows, axis=1)

    # --- unique_consecutive + blank drop, with cross-tile carry -------------
    lane = lax.broadcasted_iota(jnp.int32, (1, TT), 1)
    prev = pltpu.roll(idx_row, shift=1, axis=1)              # prev[t] = idx[t-1]
    prev = jnp.where(lane == 0,
                     jnp.broadcast_to(carry_ref[...], (1, TT)), prev)
    keep = jnp.logical_and(idx_row != prev, idx_row != jnp.int32(blank))

    # Carry this tile's last argmax for the next tile's dedup.
    carry_ref[...] = jnp.sum(jnp.where(lane == TT - 1, idx_row, 0),
                             axis=1, keepdims=True)          # (1, 1)

    # Packed, lane-dense output: label index where kept, -1 otherwise.
    out_ref[...] = jnp.where(keep, idx_row, jnp.int32(-1))


@functools.lru_cache(maxsize=None)
def _build_greedy_ctc_call(T, L, blank, t_tile):
    """Builds (and caches) the jitted pallas_call for a given problem shape."""
    if t_tile is None:
        t_tile = min(T, _DEFAULT_T_TILE)
    t_tile = max(1, min(int(t_tile), T))
    if t_tile != T and t_tile % 8 != 0:
        # (8, 128) block rule: the T block dim must be a multiple of 8 or == T.
        t_tile = min(T, ((t_tile + 7) // 8) * 8)

    grid = (pl.cdiv(T, t_tile),)
    kernel = functools.partial(_ctc_greedy_kernel, blank=blank)

    call = pl.pallas_call(
        kernel,
        out_shape=jax.ShapeDtypeStruct((1, T), jnp.int32),
        grid_spec=pltpu.PrefetchScalarGridSpec(
            num_scalar_prefetch=0,
            grid=grid,
            in_specs=[pl.BlockSpec((t_tile, L), lambda i: (i, 0))],
            out_specs=pl.BlockSpec((1, t_tile), lambda i: (0, i)),
            scratch_shapes=[pltpu.VMEM((1, 1), jnp.int32)]),   # dedup carry
        compiler_params=pltpu.CompilerParams(
            # The cross-tile dedup carry makes the T axis sequential.
            dimension_semantics=("arbitrary",)),
    )
    return jax.jit(call)


def greedy_ctc_tokens(emission: jax.Array, blank: int = BLANK, t_tile=None):
    """Runs the Pallas kernel. emission: [num_seq, num_label] float32.

    Returns a (1, num_seq) int32 array: per frame, the argmax label index if
    the frame survives greedy CTC collapse, else -1."""
    T, L = emission.shape
    return _build_greedy_ctc_call(T, L, blank, t_tile)(emission)


def greedy_ctc_decode(emission: jax.Array, labels=LABELS, blank: int = BLANK,
                      t_tile=None) -> str:
    packed = jax.block_until_ready(greedy_ctc_tokens(emission, blank, t_tile))
    arr = np.asarray(packed).ravel()
    kept = arr[arr >= 0]        # vectorized: drop collapsed repeats & blanks
    # TODO(synk): variable-length string join has no Pallas equivalent; all
    # numeric work (argmax, collapse, blank drop) runs on-TPU above.
    return ''.join(labels[int(i)] for i in kept)


def _reference_decode(emission_np: np.ndarray, labels=LABELS,
                      blank: int = BLANK) -> str:
    idx = np.argmax(emission_np, axis=-1)
    keep = np.ones(idx.shape, dtype=bool)
    keep[1:] = idx[1:] != idx[:-1]
    keep &= idx != blank
    return ''.join(labels[int(i)] for i in idx[keep])


if __name__ == "__main__":
    key = jax.random.PRNGKey(0)
    L = len(LABELS)

    # Case 1: tiny single-block path (original module-scale shapes).
    e_small = jax.random.normal(key, (16, L), dtype=jnp.float32)

    # Case 2: multi-tile path (grid=(2,)) with a repeated symbol and a run of
    # blanks forced across the tile boundary at t=128, exercising the
    # cross-tile unique_consecutive carry.
    k2, _ = jax.random.split(key)
    e_big = jax.random.normal(k2, (256, L), dtype=jnp.float32)
    boost = jnp.zeros((256, L), jnp.float32)
    boost = boost.at[124:132, 5].set(50.0)       # same symbol straddles boundary
    boost = boost.at[132:136, BLANK].set(50.0)   # followed by blanks
    e_big = e_big + boost

    for emission, t_tile in ((e_small, None), (e_big, 128)):
        got = greedy_ctc_decode(emission, t_tile=t_tile)
        want = _reference_decode(np.asarray(emission))
        assert got == want, (got, want)

    print("KERNEL_OK")
</pallas_src>

<mosaic_0001>
module attributes {stable_mosaic.version = 11 : i64} {
  func.func @_ctc_greedy_kernel(%arg0: i32, %arg1: memref<16x29xf32, #tpu.memory_space<vmem>>, %arg2: memref<1x16xi32, #tpu.memory_space<vmem>>, %arg3: memref<1x1xi32, #tpu.memory_space<vmem>>) attributes {dimension_semantics = [#tpu.dimension_semantics<arbitrary>], iteration_bounds = array<i64: 1>, scalar_prefetch = 0 : i64, scratch_operands = 1 : i64, tpu.core_type = #tpu.core_type<tc>, window_params = [{transform_indices = @transform_0, window_bounds = array<i64: 16, 29>}, {transform_indices = @transform_1, window_bounds = array<i64: 1, 16>}]} {
    %c0_i32 = arith.constant 0 : i32
    %0 = arith.cmpi eq, %arg0, %c0_i32 : i32
    %1 = arith.extui %0 : i1 to i32
    %c0_i32_0 = arith.constant 0 : i32
    %2 = arith.cmpi ne, %1, %c0_i32_0 : i32
    scf.if %2 {
      %c-1_i32_17 = arith.constant -1 : i32
      %48 = vector.broadcast %c-1_i32_17 : i32 to vector<1x1xi32>
      %c0_18 = arith.constant 0 : index
      %c0_19 = arith.constant 0 : index
      %49 = vector.load %arg3[%c0_18, %c0_19] : memref<1x1xi32, #tpu.memory_space<vmem>>, vector<1x1xi32>
      tpu.vector_store %arg3[%c0_18, %c0_19], %48 {strides = array<i32>} : memref<1x1xi32, #tpu.memory_space<vmem>>, vector<1x1xi32>,
    } else {
    }
    %c0 = arith.constant 0 : index
    %c0_1 = arith.constant 0 : index
    %3 = vector.load %arg1[%c0, %c0_1] : memref<16x29xf32, #tpu.memory_space<vmem>>, vector<16x29xf32>
    %cst = arith.constant dense<0xFF800000> : vector<16xf32>
    %4 = vector.multi_reduction <maximumf>, %3, %cst [1] : vector<16x29xf32> to vector<16xf32>
    %5 = vector.shape_cast %4 : vector<16xf32> to vector<16x1xf32>
    %6 = tpu.iota {dimensions = array<i32: 1>} : vector<16x29xi32>
    %7 = vector.broadcast %5 : vector<16x1xf32> to vector<16x29xf32>
    %8 = arith.cmpf oeq, %3, %7 : vector<16x29xf32>
    %c29_i32 = arith.constant 29 : i32
    %9 = vector.broadcast %c29_i32 : i32 to vector<16x29xi32>
    %10 = arith.select %8, %6, %9 : vector<16x29xi1>, vector<16x29xi32>
    %cst_2 = arith.constant dense<2147483647> : vector<16xi32>
    %11 = vector.multi_reduction <minsi>, %10, %cst_2 [1] : vector<16x29xi32> to vector<16xi32>
    %12 = vector.shape_cast %11 : vector<16xi32> to vector<16x1xi32>
    %c29_i32_3 = arith.constant 29 : i32
    %13 = vector.broadcast %c29_i32_3 : i32 to vector<16x1xi32>
    %14 = arith.cmpi sge, %12, %13 : vector<16x1xi32>
    %c0_i32_4 = arith.constant 0 : i32
    %15 = vector.broadcast %c0_i32_4 : i32 to vector<16x1xi32>
    %16 = arith.select %14, %15, %12 : vector<16x1xi1>, vector<16x1xi32>
    %17 = tpu.iota {dimensions = array<i32: 0>} : vector<16x16xi32>
    %18 = tpu.iota {dimensions = array<i32: 1>} : vector<16x16xi32>
    %19 = arith.cmpi eq, %17, %18 : vector<16x16xi32>
    %20 = vector.shape_cast %16 : vector<16x1xi32> to vector<16x1xi32>
    %21 = vector.broadcast %20 : vector<16x1xi32> to vector<16x16xi32>
    %c0_i32_5 = arith.constant 0 : i32
    %22 = vector.broadcast %c0_i32_5 : i32 to vector<16x16xi32>
    %23 = arith.select %19, %21, %22 : vector<16x16xi1>, vector<16x16xi32>
    %cst_6 = arith.constant dense<0> : vector<16xi32>
    %24 = vector.multi_reduction <add>, %23, %cst_6 [0] : vector<16x16xi32> to vector<16xi32>
    %25 = vector.shape_cast %24 : vector<16xi32> to vector<1x16xi32>
    %26 = tpu.iota {dimensions = array<i32: 1>} : vector<1x16xi32>
    %c1_i32 = arith.constant 1 : i32
    %27 = tpu.dynamic_rotate %25 by %c1_i32 dim 1 : vector<1x16xi32>, i32 -> vector<1x16xi32>
    %c0_i32_7 = arith.constant 0 : i32
    %28 = vector.broadcast %c0_i32_7 : i32 to vector<1x16xi32>
    %29 = arith.cmpi eq, %26, %28 : vector<1x16xi32>
    %c0_8 = arith.constant 0 : index
    %c0_9 = arith.constant 0 : index
    %30 = vector.load %arg3[%c0_8, %c0_9] : memref<1x1xi32, #tpu.memory_space<vmem>>, vector<1x1xi32>
    %31 = vector.shape_cast %30 : vector<1x1xi32> to vector<1x1xi32>
    %32 = vector.broadcast %31 : vector<1x1xi32> to vector<1x16xi32>
    %33 = arith.select %29, %32, %27 : vector<1x16xi1>, vector<1x16xi32>
    %34 = arith.cmpi ne, %25, %33 : vector<1x16xi32>
    %c0_i32_10 = arith.constant 0 : i32
    %35 = vector.broadcast %c0_i32_10 : i32 to vector<1x16xi32>
    %36 = arith.cmpi ne, %25, %35 : vector<1x16xi32>
    %37 = arith.andi %34, %36 : vector<1x16xi1>
    %c15_i32 = arith.constant 15 : i32
    %38 = vector.broadcast %c15_i32 : i32 to vector<1x16xi32>
    %39 = arith.cmpi eq, %26, %38 : vector<1x16xi32>
    %c0_i32_11 = arith.constant 0 : i32
    %40 = vector.broadcast %c0_i32_11 : i32 to vector<1x16xi32>
    %41 = arith.select %39, %25, %40 : vector<1x16xi1>, vector<1x16xi32>
    %cst_12 = arith.constant dense<0> : vector<1xi32>
    %42 = vector.multi_reduction <add>, %41, %cst_12 [1] : vector<1x16xi32> to vector<1xi32>
    %43 = vector.shape_cast %42 : vector<1xi32> to vector<1x1xi32>
    %c0_13 = arith.constant 0 : index
    %c0_14 = arith.constant 0 : index
    %44 = vector.load %arg3[%c0_13, %c0_14] : memref<1x1xi32, #tpu.memory_space<vmem>>, vector<1x1xi32>
    tpu.vector_store %arg3[%c0_13, %c0_14], %43 {strides = array<i32>} : memref<1x1xi32, #tpu.memory_space<vmem>>, vector<1x1xi32>,
    %c-1_i32 = arith.constant -1 : i32
    %45 = vector.broadcast %c-1_i32 : i32 to vector<1x16xi32>
    %46 = arith.select %37, %25, %45 : vector<1x16xi1>, vector<1x16xi32>
    %c0_15 = arith.constant 0 : index
    %c0_16 = arith.constant 0 : index
    %47 = vector.load %arg2[%c0_15, %c0_16] : memref<1x16xi32, #tpu.memory_space<vmem>>, vector<1x16xi32>
    tpu.vector_store %arg2[%c0_15, %c0_16], %46 {strides = array<i32>} : memref<1x16xi32, #tpu.memory_space<vmem>>, vector<1x16xi32>,
    return
  }
  func.func @transform_0(%arg0: i32) -> (i32, i32) {
    %c0_i32 = arith.constant 0 : i32
    %c0_i32_0 = arith.constant 0 : i32
    return %arg0, %c0_i32 : i32, i32
  }
  func.func @transform_1(%arg0: i32) -> (i32, i32) {
    %c0_i32 = arith.constant 0 : i32
    %c0_i32_0 = arith.constant 0 : i32
    return %c0_i32, %arg0 : i32, i32
  }
}

</mosaic_0001>

<bundles_post_ra>
// kernel: tpu_custom_call.1
= control target key start
LH: loop header
LB: loop body
LE: loop exit
PB: predicated region body
PF: predicated region fallthrough
CT: control target
= control target key end

     0   :  { %6 = vsyncpa [#allocation4], 0  ;;  %s246_s0 = inlined_call_operand.hbm [shape: f32[16,29], index: 0, kind: input, shape index: {}]   ;;  %s247_s1 = inlined_call_operand.hbm [shape: s32[1,16], index: 1, kind: output, shape index: {}]  }
   0x1   :  { %7 = vsyncpa [#allocation5], 0  ;;  %s205_s6 = smov [#allocation3]  }
   0x2   :  { %s13_s7 = sshll.u32 %s205_s6, 4  ;;  %s14_s7 = int_to_ptr.vmem [resolvable:$true] %s13_s7 }
   0x3   :  { %s169_s8 = scalar_lea.vmem %s14_s7, 256  ;;  %p174_p1 = scmp.lt.s32.totalorder %s14_s7, %s14_s7 }
   0x4   :  { %p170_p0 = scmp.ne.s32.totalorder %s14_s7, %s169_s8  ;;  %p175_p2 = scmp.lt.s32.totalorder %s169_s8, %s169_s8 }
   0x6   :  { %p176_p3 = por %p175_p2, %p174_p1 }
   0x8   :  { %p177_p4 = pnand %p176_p3, %p170_p0 }
   0xa   :  { %180 = shalt.err (!%p177_p4)
}
   0xb   :  { %s206_s9 = smov 128   ;;  %s207_s10 = smov 8  }
   0xc   :  { %19 = dma.hbm_to_vmem [thread:$0]  %s246_s0, 256, %s14_s7, [#allocation4], %s206_s9, %s206_s9, %s207_s10  }
   0xd   :  { %201 = dma.done.wait [#allocation4], 256  }
   0xe   :  { %202 = vsyncadd [#allocation4], 4294967040  ;;  %vm27_vm0 = vcmask 0   ;;  %v208_v0 = vmov 4294967295   ;;  %vm31_vm1 = vcmask 236544   ;;  %v29_v1 = vld [vmem:[#allocation3] sm:$0xff]  ;;  %v38_v5 = vlaneseq }
   0xf   :  { %28 = vst.msk [vmem:[#allocation2] sm:$0x1] %vm27_vm0, %v208_v0  ;;  %v30_v2 = vld [vmem:[#allocation3 + $0x8] sm:$0xff]  ;;  %v32_v3 = vsel %vm31_vm1, %v29_v1, -inf  ;;  %vm85_vm9 = vcmask 130048   ;;  %s209_s0 = smov 16  }
  0x10   :  { %33 = vmax.xlane.f32.xlu0 %v32_v3  ;;  %v35_v4 = vsel %vm31_vm1, %v30_v2, -inf  ;;  %v229_v6 = vand.u32 127, %v38_v5  ;;  %v79_v30 = vshrl.u32 %v38_v5, 7  ;;  %v210_v54 = vmov 0   ;;  %s211_s13 = smov 113   ;;  %s212_s14 = smov [#allocation6]  }
  0x11   :  { %160 = vset.pattern.permute.xlu0 %v210_v54  ;;  %vm95_vm12 = vcmask 1047680   ;;  %s143_s15 = sshll.u32 %s212_s14, 4  ;;  %s144_s15 = int_to_ptr.vmem [resolvable:$true] %s143_s15 }
  0x12   :  { %v80_v32 = vadd.s32 8, %v79_v30  ;;  %vm81_vm7 = vcmp.eq.s32.totalorder %v79_v30, %v229_v6  ;;  %vm117_vm11 = vcmp.eq.s32.totalorder %v229_v6, 15  ;;  %vm102_vm13 = vcmp.eq.s32.totalorder %v229_v6, 0  ;;  %s181_s16 = scalar_lea.vmem %s144_s15, 16  ;;  %s185_s17 = scalar_lea.vmem %s144_s15, 32 }
  0x13   :  { %p182_p5 = scmp.ne.s32.totalorder %s144_s15, %s181_s16  ;;  %p186_p6 = scmp.lt.s32.totalorder %s144_s15, %s144_s15 }
  0x14   :  { %36 = vmax.xlane.f32.xlu0 %v35_v4  ;;  %vm82_vm8 = vcmp.eq.s32.totalorder %v80_v32, %v229_v6  ;;  %v109_v4 = vsub.s32 0, %v79_v30  ;;  %p187_p7 = scmp.lt.s32.totalorder %s185_s17, %s181_s16 }
  0x16   :  { %v103_v55 = vld [vmem:[#allocation2] sm:$0x1]  ;;  %p188_p8 = por %p187_p7, %p186_p6 }
  0x18   :  { %p189_p9 = pnand %p188_p8, %p182_p5 }
  0x99   :  { %v34_v7 = vpop.xlane.xlu0 %33 }
  0x9a   :  { %vm40_vm2 = vcmp.eq.f32.partialorder %v29_v1, %v34_v7 }
  0x9b   :  { %v42_v8 = vsel %vm40_vm2, %v229_v6, 29 }
  0x9c   :  { %v44_v9 = vsel %vm31_vm1, %v42_v8, 2147483647 }
  0x9d   :  { %v37_v10 = vpop.xlane.xlu0 %36  ;;  %v46_v11 = vshra.s32 %v44_v9, 16  ;;  %v45_v17 = vand.u32 65535, %v44_v9 }
  0x9e   :  { %vm41_vm3 = vcmp.eq.f32.partialorder %v30_v2, %v37_v10 }
  0x9f   :  { %v43_v12 = vsel %vm41_vm3, %v229_v6, 29  ;;  %v48_v13 = vcvt.s32.f32 %v46_v11  ;;  %v47_v19 = vcvt.s32.f32 %v45_v17 }
  0xa0   :  { %v59_v14 = vsel %vm31_vm1, %v43_v12, 2147483647  ;;  %vm135_vm1 = vcmask 122880  }
  0xa1   :  { %49 = vmin.xlane.f32.xlu1 %v48_v13  ;;  %v61_v15 = vshra.s32 %v59_v14, 16  ;;  %v60_v20 = vand.u32 65535, %v59_v14 }
  0xa3   :  { %v63_v16 = vcvt.s32.f32 %v61_v15  ;;  %v62_v23 = vcvt.s32.f32 %v60_v20 }
  0xa5   :  { %64 = vmin.xlane.f32.xlu1 %v63_v16 }
 0x12a   :  { %v50_v18 = vpop.xlane.xlu1 %49 }
 0x12b   :  { %vm51_vm4 = vcmp.eq.f32.partialorder %v48_v13, %v50_v18  ;;  %v56_v25 = vcvt.f32.s32 %v50_v18 }
 0x12c   :  { %v52_v21 = vsel %vm51_vm4, %v47_v19, inf }
 0x12d   :  { %53 = vmin.xlane.f32.xlu0 %v52_v21  ;;  %v57_v27 = vshll.u32 %v56_v25, 16 }
 0x12e   :  { %v65_v22 = vpop.xlane.xlu1 %64 }
 0x12f   :  { %vm66_vm5 = vcmp.eq.f32.partialorder %v63_v16, %v65_v22  ;;  %v71_v28 = vcvt.f32.s32 %v65_v22 }
 0x130   :  { %v67_v24 = vsel %vm66_vm5, %v62_v23, inf }
 0x131   :  { %68 = vmin.xlane.f32.xlu1 %v67_v24  ;;  %v72_v34 = vshll.u32 %v71_v28, 16 }
 0x1b6   :  { %v54_v26 = vpop.xlane.xlu0 %53 }
 0x1b7   :  { %v55_v29 = vcvt.f32.s32 %v54_v26 }
 0x1b9   :  { %v58_v31 = vadd.s32 %v57_v27, %v55_v29 }
 0x1ba   :  { %v69_v33 = vpop.xlane.xlu1 %68 }
 0x1bb   :  { %vm74_vm6 = vcmp.ge.s32.totalorder %v58_v31, 29  ;;  %v70_v35 = vcvt.f32.s32 %v69_v33 }
 0x1bc   :  { %v76_v36 = vsel %vm74_vm6, 0, %v58_v31 }
 0x1bd   :  { %v73_v37 = vadd.s32 %v72_v34, %v70_v35  ;;  %v83_v38 = vsel %vm81_vm7, %v76_v36, 0 }
 0x1be   :  { %v86_v41 = vsel %vm85_vm9, %v83_v38, 0 }
 0x1bf   :  { %vm75_vm10 = vcmp.ge.s32.totalorder %v73_v37, 29 }
 0x1c0   :  { %v77_v39 = vsel %vm75_vm10, 0, %v73_v37 }
 0x1c1   :  { %v84_v40 = vsel %vm82_vm8, %v77_v39, 0 }
 0x1c2   :  { %v87_v42 = vsel %vm85_vm9, %v84_v40, 0 }
 0x1c3   :  { %v88_v43 = vadd.s32 %v87_v42, %v86_v41 }
 0x1c5   :  { %v89_v44 = vrot.slane %v88_v43, 4 }
 0x1c7   :  { %v90_v45 = vadd.s32 %v89_v44, %v88_v43 }
 0x1c9   :  { %v91_v46 = vrot.slane %v90_v45, 2 }
 0x1cb   :  { %v92_v47 = vadd.s32 %v91_v46, %v90_v45 }
 0x1cd   :  { %v93_v48 = vrot.slane %v92_v47, 1 }
 0x1cf   :  { %v94_v49 = vadd.s32 %v93_v48, %v92_v47 }
 0x1d1   :  { %96 = vrot.lane.b32.xlu0 %v94_v49, %s209_s0  ;;  %v118_v50 = vsel %vm117_vm11, %v94_v49, 0  ;;  %vm115_vm15 = vcmp.ne.s32.totalorder %v94_v49, 0 }
 0x1d2   :  { %v119_v51 = vsel %vm85_vm9, %v118_v50, 0 }
 0x1d3   :  { %v120_v52 = vand.u32 65535, %v119_v51  ;;  %v121_v58 = vshrl.u32 %v119_v51, 16 }
 0x1d5   :  { %v122_v53 = vcvt.s32.f32 %v120_v52  ;;  %v123_v59 = vcvt.s32.f32 %v121_v58 }
 0x1f0   :  { %124 = vadd.xlane.f32.xlu0 %v122_v53 }
 0x206   :  { %105 = vperm.xlu0 %160, %v103_v55  }
 0x243   :  { %v97_v56 = vpop.permute.xlu0 %96 }
 0x244   :  { %v98_v57 = vsel %vm95_vm12, %v97_v56, %v94_v49 }
 0x245   :  { %99 = vrot.lane.b32.xlu1 %v98_v57, %s209_s0 }
 0x269   :  { %126 = vadd.xlane.f32.xlu1 %v123_v59 }
 0x279   :  { %v125_v62 = vpop.xlane.xlu0 %124 }
 0x27a   :  { %v128_v1 = vcvt.f32.s32 %v125_v62 }
 0x281   :  { %v106_v5 = vpop.permute.xlu0 %105 }
 0x282   :  { %v110_v7 = vrot.slane %v106_v5, %v109_v4 }
 0x2b7   :  { %v100_v60 = vpop.permute.xlu1 %99 }
 0x2b8   :  { %v101_v61 = vsel %vm95_vm12, %v100_v60, %v94_v49 }
 0x2b9   :  { %111 = vrot.lane.b32.xlu1 %v101_v61, %s211_s13 }
 0x2f2   :  { %v127_v63 = vpop.xlane.xlu1 %126 }
 0x2f3   :  { %v129_v0 = vcvt.f32.s32 %v127_v63 }
 0x2f5   :  { %v130_v2 = vshll.u32 %v129_v0, 16 }
 0x2f7   :  { %v131_v3 = vadd.s32 %v130_v2, %v128_v1 }
 0x2f9   :  { %133 = vst.msk [vmem:[#allocation2] sm:$0x1] %vm27_vm0, %v131_v3 }
 0x32b   :  { %v112_v8 = vpop.permute.xlu1 %111 }
 0x32c   :  { %v113_v9 = vsel %vm102_vm13, %v110_v7, %v112_v8 }
 0x32d   :  { %vm114_vm14 = vcmp.ne.s32.totalorder %v94_v49, %v113_v9 }
 0x32e   :  { %vm116_vm2 = vmand %vm114_vm14, %vm115_vm15 }
 0x32f   :  { %v134_v10 = vsel %vm116_vm2, %v94_v49, 4294967295 }
 0x330   :  { %136 = vst.msk [vmem:[#allocation6] sm:$0x1] %vm135_vm1, %v134_v10 }
 0x331   :  { %192 = shalt.err (!%p189_p9)
}
 0x332   :  { %146 = dma.vmem_to_hbm [thread:$0]  %s144_s15, 16, %s247_s1, [#allocation5]  }
 0x333   :  { %203 = dma.done.wait [#allocation5], 16  }
 0x334   :  { %204 = vsyncadd [#allocation5], 4294967280 }
 0x335   :  { %150 = vsyncpa [#allocation4], 1 }
 0x336   :  { %151 = vsyncpa [#allocation5], 1 }

</bundles_post_ra>
